<compile_context>
chip_gen: v6e
topology: v6e:2x2x1
jax: 0.10.0
libtpu: 0.0.40
codegen_flags: <defaults>
</compile_context>

<pallas_src>
import jax
import jax.numpy as jnp
from jax.experimental import pallas as pl
from jax.experimental.pallas import tpu as pltpu

EPS = 1e-5


def _bn_kernel(x_ref, g_ref, b_ref, o_ref):
    # x_ref: (N, C, HW) f32  — channels on sublanes, spatial on lanes
    # g_ref: (1, C, 1)  f32  — gamma
    # b_ref: (1, C, 1)  f32  — beta
    # o_ref: (N, C, HW) f32
    x = x_ref[...]
    n, c, hw = x.shape
    inv_l = 1.0 / float(n * hw)

    # Per-channel mean: lane reduction first, then the (tiny) batch axis.
    s = jnp.sum(x, axis=2, keepdims=True)            # (N, C, 1)
    s = jnp.sum(s, axis=0, keepdims=True)            # (1, C, 1)
    mean = s * inv_l                                 # (1, C, 1)

    # Two-pass biased variance (training-mode normalization), all f32.
    centered = x - mean                              # (N, C, HW)
    sq = jnp.sum(centered * centered, axis=2, keepdims=True)   # (N, C, 1)
    sq = jnp.sum(sq, axis=0, keepdims=True)          # (1, C, 1)
    var = sq * inv_l                                 # (1, C, 1)

    inv_std = jax.lax.rsqrt(var + EPS)               # (1, C, 1), EUP
    scale = g_ref[...] * inv_std                     # (1, C, 1)

    # Single elementwise pass over the full array.
    o_ref[...] = centered * scale + b_ref[...]


@jax.jit
def batchnorm2d_pallas(x_nchw, gamma, beta):
    """x_nchw: (N, C, H, W) f32; gamma, beta: (C,) f32. Returns NCHW f32."""
    n, c, h, w = x_nchw.shape
    hw = h * w

    # All of these reshapes are row-major layout-preserving views (bitcasts),
    # so no extra copy/transpose ops are launched around the pallas_call.
    x_v = x_nchw.reshape(n, c, hw).astype(jnp.float32)
    g_v = gamma.reshape(1, c, 1).astype(jnp.float32)
    b_v = beta.reshape(1, c, 1).astype(jnp.float32)

    out_v = pl.pallas_call(
        _bn_kernel,
        out_shape=jax.ShapeDtypeStruct((n, c, hw), jnp.float32),
        in_specs=[
            pl.BlockSpec(memory_space=pltpu.MemorySpace.VMEM),
            pl.BlockSpec(memory_space=pltpu.MemorySpace.VMEM),
            pl.BlockSpec(memory_space=pltpu.MemorySpace.VMEM),
        ],
        out_specs=pl.BlockSpec(memory_space=pltpu.MemorySpace.VMEM),
        input_output_aliases={0: 0},   # output reuses the input HBM buffer
    )(x_v, g_v, b_v)

    # Free view back to NCHW.
    return out_v.reshape(n, c, h, w)


if __name__ == "__main__":
    key = jax.random.PRNGKey(0)
    kx, kg, kb = jax.random.split(key, 3)

    N, C, H, W = 1, 344, 7, 7
    x = jax.random.normal(kx, (N, C, H, W), dtype=jnp.float32)
    # PyTorch default init is ones/zeros; perturb so the affine path is
    # actually exercised.
    gamma = 1.0 + 0.1 * jax.random.normal(kg, (C,), dtype=jnp.float32)
    beta = 0.1 * jax.random.normal(kb, (C,), dtype=jnp.float32)

    out = batchnorm2d_pallas(x, gamma, beta)
    out = jax.block_until_ready(out)

    # Reference check in plain JAX (training-mode batchnorm semantics).
    mean = jnp.mean(x, axis=(0, 2, 3), keepdims=True)
    var = jnp.mean((x - mean) ** 2, axis=(0, 2, 3), keepdims=True)
    ref = (x - mean) / jnp.sqrt(var + EPS) * gamma.reshape(1, C, 1, 1) \
        + beta.reshape(1, C, 1, 1)

    assert out.shape == (N, C, H, W)
    assert jnp.max(jnp.abs(out - ref)) < 1e-4

    print("KERNEL_OK")
</pallas_src>

<mosaic_0001>
module attributes {stable_mosaic.version = 11 : i64} {
  func.func @_bn_kernel(%arg0: memref<1x344x49xf32, #tpu.memory_space<vmem>>, %arg1: memref<1x344x1xf32, #tpu.memory_space<vmem>>, %arg2: memref<1x344x1xf32, #tpu.memory_space<vmem>>, %arg3: memref<1x344x49xf32, #tpu.memory_space<vmem>>) attributes {dimension_semantics = [], scalar_prefetch = 0 : i64, scratch_operands = 0 : i64, tpu.core_type = #tpu.core_type<tc>} {
    %c0 = arith.constant 0 : index
    %c0_0 = arith.constant 0 : index
    %c0_1 = arith.constant 0 : index
    %0 = vector.load %arg0[%c0, %c0_0, %c0_1] : memref<1x344x49xf32, #tpu.memory_space<vmem>>, vector<1x344x49xf32>
    %cst = arith.constant dense<0.000000e+00> : vector<1x344xf32>
    %1 = vector.multi_reduction <add>, %0, %cst [2] : vector<1x344x49xf32> to vector<1x344xf32>
    %2 = vector.shape_cast %1 : vector<1x344xf32> to vector<1x344x1xf32>
    %cst_2 = arith.constant dense<0.000000e+00> : vector<344x1xf32>
    %3 = vector.multi_reduction <add>, %2, %cst_2 [0] : vector<1x344x1xf32> to vector<344x1xf32>
    %4 = vector.shape_cast %3 : vector<344x1xf32> to vector<1x344x1xf32>
    %cst_3 = arith.constant 0.0204081628 : f32
    %5 = vector.broadcast %cst_3 : f32 to vector<1x344x1xf32>
    %6 = arith.mulf %4, %5 : vector<1x344x1xf32>
    %7 = vector.broadcast %6 : vector<1x344x1xf32> to vector<1x344x49xf32>
    %8 = arith.subf %0, %7 : vector<1x344x49xf32>
    %9 = arith.mulf %8, %8 : vector<1x344x49xf32>
    %cst_4 = arith.constant dense<0.000000e+00> : vector<1x344xf32>
    %10 = vector.multi_reduction <add>, %9, %cst_4 [2] : vector<1x344x49xf32> to vector<1x344xf32>
    %11 = vector.shape_cast %10 : vector<1x344xf32> to vector<1x344x1xf32>
    %cst_5 = arith.constant dense<0.000000e+00> : vector<344x1xf32>
    %12 = vector.multi_reduction <add>, %11, %cst_5 [0] : vector<1x344x1xf32> to vector<344x1xf32>
    %13 = vector.shape_cast %12 : vector<344x1xf32> to vector<1x344x1xf32>
    %cst_6 = arith.constant 0.0204081628 : f32
    %14 = vector.broadcast %cst_6 : f32 to vector<1x344x1xf32>
    %15 = arith.mulf %13, %14 : vector<1x344x1xf32>
    %cst_7 = arith.constant 9.99999974E-6 : f32
    %16 = vector.broadcast %cst_7 : f32 to vector<1x344x1xf32>
    %17 = arith.addf %15, %16 : vector<1x344x1xf32>
    %18 = math.rsqrt %17 : vector<1x344x1xf32>
    %c0_8 = arith.constant 0 : index
    %c0_9 = arith.constant 0 : index
    %c0_10 = arith.constant 0 : index
    %19 = vector.load %arg1[%c0_8, %c0_9, %c0_10] : memref<1x344x1xf32, #tpu.memory_space<vmem>>, vector<1x344x1xf32>
    %20 = arith.mulf %19, %18 : vector<1x344x1xf32>
    %21 = vector.broadcast %20 : vector<1x344x1xf32> to vector<1x344x49xf32>
    %22 = arith.mulf %8, %21 : vector<1x344x49xf32>
    %c0_11 = arith.constant 0 : index
    %c0_12 = arith.constant 0 : index
    %c0_13 = arith.constant 0 : index
    %23 = vector.load %arg2[%c0_11, %c0_12, %c0_13] : memref<1x344x1xf32, #tpu.memory_space<vmem>>, vector<1x344x1xf32>
    %24 = vector.broadcast %23 : vector<1x344x1xf32> to vector<1x344x49xf32>
    %25 = arith.addf %22, %24 : vector<1x344x49xf32>
    %c0_14 = arith.constant 0 : index
    %c0_15 = arith.constant 0 : index
    %c0_16 = arith.constant 0 : index
    %26 = vector.load %arg3[%c0_14, %c0_15, %c0_16] : memref<1x344x49xf32, #tpu.memory_space<vmem>>, vector<1x344x49xf32>
    tpu.vector_store %arg3[%c0_14, %c0_15, %c0_16], %25 {strides = array<i32>} : memref<1x344x49xf32, #tpu.memory_space<vmem>>, vector<1x344x49xf32>,
    return
  }
}

</mosaic_0001>

<bundles_post_ra>
// kernel: batchnorm2d_pallas.1
= control target key start
LH: loop header
LB: loop body
LE: loop exit
PB: predicated region body
PF: predicated region fallthrough
CT: control target
= control target key end

     0   :  { %vm57_vm0 = vcmask 400384   ;;  %s2581_s0 = inlined_call_operand.vmem [shape: f32[1,344,49], index: 0, kind: input, shape index: {}, may-alias: {0,3}]   ;;  %s2582_s2 = inlined_call_operand.vmem [shape: f32[1,344,1], index: 2, kind: input, shape index: {}]   ;;  %s2583_s1 = inlined_call_operand.vmem [shape: f32[1,344,1], index: 1, kind: input, shape index: {}]   ;;  %s2584_s3 = inlined_call_operand.vmem [shape: f32[1,344,49], index: 3, kind: output, shape index: {}, may-alias: {0,3}]  }
   0x1   :  { %v1465_v0 = vld [vmem:[%s2581_s0] sm:$0xff]  ;;  %v1470_v1 = vld [vmem:[%s2581_s0 + $0x10] sm:$0xff]  ;;  %v1475_v2 = vld [vmem:[%s2581_s0 + $0x8] sm:$0xff] }
   0x2   :  { %v58_v3 = vsel %vm57_vm0, %v1465_v0, 0.0  ;;  %v64_v4 = vsel %vm57_vm0, %v1470_v1, 0.0  ;;  %v1484_v5 = vld [vmem:[%s2581_s0 + $0x18] sm:$0xff]  ;;  %v61_v6 = vsel %vm57_vm0, %v1475_v2, 0.0  ;;  %v1493_v8 = vld [vmem:[%s2581_s0 + $0x28] sm:$0xff]  ;;  %v1498_v9 = vld [vmem:[%s2581_s0 + $0x20] sm:$0xff] }
   0x3   :  { %59 = vadd.xlane.f32.xlu0 %v58_v3  ;;  %65 = vadd.xlane.f32.xlu1 %v64_v4  ;;  %v67_v7 = vsel %vm57_vm0, %v1484_v5, 0.0  ;;  %v73_v10 = vsel %vm57_vm0, %v1493_v8, 0.0  ;;  %v70_v11 = vsel %vm57_vm0, %v1498_v9, 0.0  ;;  %v1507_v12 = vld [vmem:[%s2581_s0 + $0x38] sm:$0xff]  ;;  %v1512_v13 = vld [vmem:[%s2581_s0 + $0x30] sm:$0xff]  ;;  %v1521_v16 = vld [vmem:[%s2581_s0 + $0x48] sm:$0xff] }
   0x4   :  { %v79_v14 = vsel %vm57_vm0, %v1507_v12, 0.0  ;;  %v76_v15 = vsel %vm57_vm0, %v1512_v13, 0.0  ;;  %v1526_v17 = vld [vmem:[%s2581_s0 + $0x40] sm:$0xff]  ;;  %v85_v18 = vsel %vm57_vm0, %v1521_v16, 0.0  ;;  %v1535_v20 = vld [vmem:[%s2581_s0 + $0x58] sm:$0xff]  ;;  %v1540_v21 = vld [vmem:[%s2581_s0 + $0x50] sm:$0xff] }
   0x5   :  { %v82_v19 = vsel %vm57_vm0, %v1526_v17, 0.0  ;;  %v91_v22 = vsel %vm57_vm0, %v1535_v20, 0.0  ;;  %v88_v23 = vsel %vm57_vm0, %v1540_v21, 0.0  ;;  %v1549_v24 = vld [vmem:[%s2581_s0 + $0x68] sm:$0xff]  ;;  %v1554_v25 = vld [vmem:[%s2581_s0 + $0x60] sm:$0xff]  ;;  %v1563_v28 = vld [vmem:[%s2581_s0 + $0x78] sm:$0xff] }
   0x6   :  { %v97_v26 = vsel %vm57_vm0, %v1549_v24, 0.0  ;;  %v94_v27 = vsel %vm57_vm0, %v1554_v25, 0.0  ;;  %v1568_v29 = vld [vmem:[%s2581_s0 + $0x70] sm:$0xff]  ;;  %v103_v30 = vsel %vm57_vm0, %v1563_v28, 0.0  ;;  %v1577_v32 = vld [vmem:[%s2581_s0 + $0x88] sm:$0xff]  ;;  %v1582_v33 = vld [vmem:[%s2581_s0 + $0x80] sm:$0xff] }
   0x7   :  { %62 = vadd.xlane.f32.xlu0 %v61_v6  ;;  %68 = vadd.xlane.f32.xlu1 %v67_v7  ;;  %v100_v31 = vsel %vm57_vm0, %v1568_v29, 0.0  ;;  %v109_v34 = vsel %vm57_vm0, %v1577_v32, 0.0  ;;  %v106_v35 = vsel %vm57_vm0, %v1582_v33, 0.0  ;;  %v1591_v36 = vld [vmem:[%s2581_s0 + $0x98] sm:$0xff]  ;;  %v1596_v37 = vld [vmem:[%s2581_s0 + $0x90] sm:$0xff]  ;;  %v1605_v40 = vld [vmem:[%s2581_s0 + $0xa8] sm:$0xff] }
   0x8   :  { %v115_v38 = vsel %vm57_vm0, %v1591_v36, 0.0  ;;  %v112_v39 = vsel %vm57_vm0, %v1596_v37, 0.0  ;;  %v1610_v41 = vld [vmem:[%s2581_s0 + $0xa0] sm:$0xff]  ;;  %v121_v42 = vsel %vm57_vm0, %v1605_v40, 0.0  ;;  %v1619_v44 = vld [vmem:[%s2581_s0 + $0xb8] sm:$0xff]  ;;  %v1624_v45 = vld [vmem:[%s2581_s0 + $0xb0] sm:$0xff] }
   0x9   :  { %v118_v43 = vsel %vm57_vm0, %v1610_v41, 0.0  ;;  %v127_v46 = vsel %vm57_vm0, %v1619_v44, 0.0  ;;  %v124_v47 = vsel %vm57_vm0, %v1624_v45, 0.0  ;;  %v1633_v48 = vld [vmem:[%s2581_s0 + $0xc8] sm:$0xff]  ;;  %v1638_v49 = vld [vmem:[%s2581_s0 + $0xc0] sm:$0xff]  ;;  %v1647_v52 = vld [vmem:[%s2581_s0 + $0xd8] sm:$0xff] }
   0xa   :  { %v133_v50 = vsel %vm57_vm0, %v1633_v48, 0.0  ;;  %v130_v51 = vsel %vm57_vm0, %v1638_v49, 0.0  ;;  %v1652_v53 = vld [vmem:[%s2581_s0 + $0xd0] sm:$0xff]  ;;  %v139_v54 = vsel %vm57_vm0, %v1647_v52, 0.0  ;;  %v1661_v56 = vld [vmem:[%s2581_s0 + $0xe8] sm:$0xff]  ;;  %v1666_v57 = vld [vmem:[%s2581_s0 + $0xe0] sm:$0xff] }
   0xb   :  { %74 = vadd.xlane.f32.xlu1 %v73_v10  ;;  %71 = vadd.xlane.f32.xlu0 %v70_v11  ;;  %v136_v55 = vsel %vm57_vm0, %v1652_v53, 0.0  ;;  %v145_v58 = vsel %vm57_vm0, %v1661_v56, 0.0  ;;  %v142_v59 = vsel %vm57_vm0, %v1666_v57, 0.0  ;;  %v1675_v60 = vld [vmem:[%s2581_s0 + $0xf8] sm:$0xff]  ;;  %v1680_v61 = vld [vmem:[%s2581_s0 + $0xf0] sm:$0xff]  ;;  %v1689_v3 = vld [vmem:[%s2581_s0 + $0x108] sm:$0xff] }
   0xc   :  { %v151_v62 = vsel %vm57_vm0, %v1675_v60, 0.0  ;;  %v148_v63 = vsel %vm57_vm0, %v1680_v61, 0.0  ;;  %v1694_v4 = vld [vmem:[%s2581_s0 + $0x100] sm:$0xff]  ;;  %v157_v6 = vsel %vm57_vm0, %v1689_v3, 0.0  ;;  %v1703_v10 = vld [vmem:[%s2581_s0 + $0x118] sm:$0xff]  ;;  %v1708_v11 = vld [vmem:[%s2581_s0 + $0x110] sm:$0xff] }
   0xd   :  { %v154_v7 = vsel %vm57_vm0, %v1694_v4, 0.0 }
   0xf   :  { %80 = vadd.xlane.f32.xlu1 %v79_v14  ;;  %77 = vadd.xlane.f32.xlu0 %v76_v15  ;;  %v163_v14 = vsel %vm57_vm0, %v1703_v10, 0.0  ;;  %v160_v15 = vsel %vm57_vm0, %v1708_v11, 0.0 }
  0x13   :  { %86 = vadd.xlane.f32.xlu1 %v85_v18  ;;  %83 = vadd.xlane.f32.xlu0 %v82_v19  ;;  %v1717_v18 = vld [vmem:[%s2581_s0 + $0x128] sm:$0xff]  ;;  %v1722_v19 = vld [vmem:[%s2581_s0 + $0x120] sm:$0xff] }
  0x17   :  { %92 = vadd.xlane.f32.xlu1 %v91_v22  ;;  %89 = vadd.xlane.f32.xlu0 %v88_v23  ;;  %v169_v22 = vsel %vm57_vm0, %v1717_v18, 0.0  ;;  %v166_v23 = vsel %vm57_vm0, %v1722_v19, 0.0 }
  0x1b   :  { %98 = vadd.xlane.f32.xlu1 %v97_v26  ;;  %95 = vadd.xlane.f32.xlu0 %v94_v27  ;;  %v1731_v26 = vld [vmem:[%s2581_s0 + $0x138] sm:$0xff]  ;;  %v1736_v27 = vld [vmem:[%s2581_s0 + $0x130] sm:$0xff] }
  0x1f   :  { %104 = vadd.xlane.f32.xlu1 %v103_v30  ;;  %101 = vadd.xlane.f32.xlu0 %v100_v31  ;;  %v175_v30 = vsel %vm57_vm0, %v1731_v26, 0.0  ;;  %v172_v31 = vsel %vm57_vm0, %v1736_v27, 0.0 }
  0x23   :  { %110 = vadd.xlane.f32.xlu1 %v109_v34  ;;  %107 = vadd.xlane.f32.xlu0 %v106_v35  ;;  %v1745_v34 = vld [vmem:[%s2581_s0 + $0x148] sm:$0xff]  ;;  %v1750_v35 = vld [vmem:[%s2581_s0 + $0x140] sm:$0xff] }
  0x27   :  { %116 = vadd.xlane.f32.xlu1 %v115_v38  ;;  %113 = vadd.xlane.f32.xlu0 %v112_v39  ;;  %v181_v38 = vsel %vm57_vm0, %v1745_v34, 0.0  ;;  %v178_v39 = vsel %vm57_vm0, %v1750_v35, 0.0 }
  0x2b   :  { %122 = vadd.xlane.f32.xlu1 %v121_v42  ;;  %119 = vadd.xlane.f32.xlu0 %v118_v43  ;;  %v1759_v42 = vld [vmem:[%s2581_s0 + $0x150] sm:$0xff] }
  0x2c   :  { %v184_v43 = vsel %vm57_vm0, %v1759_v42, 0.0 }
  0x2f   :  { %128 = vadd.xlane.f32.xlu1 %v127_v46  ;;  %125 = vadd.xlane.f32.xlu0 %v124_v47  ;;  %v1441_v46 = vmov 0  }
  0x30   :  { %1354 = vset.pattern.permute.xlu1 %v1441_v46  ;;  %1353 = vset.pattern.permute.xlu0 %v1441_v46 }
  0x33   :  { %134 = vadd.xlane.f32.xlu1 %v133_v50  ;;  %131 = vadd.xlane.f32.xlu0 %v130_v51 }
  0x37   :  { %140 = vadd.xlane.f32.xlu1 %v139_v54  ;;  %137 = vadd.xlane.f32.xlu0 %v136_v55 }
  0x3b   :  { %146 = vadd.xlane.f32.xlu1 %v145_v58  ;;  %143 = vadd.xlane.f32.xlu0 %v142_v59 }
  0x3f   :  { %152 = vadd.xlane.f32.xlu1 %v151_v62  ;;  %149 = vadd.xlane.f32.xlu0 %v148_v63 }
  0x43   :  { %158 = vadd.xlane.f32.xlu1 %v157_v6  ;;  %155 = vadd.xlane.f32.xlu0 %v154_v7 }
  0x47   :  { %164 = vadd.xlane.f32.xlu1 %v163_v14  ;;  %161 = vadd.xlane.f32.xlu0 %v160_v15 }
  0x4b   :  { %170 = vadd.xlane.f32.xlu1 %v169_v22  ;;  %167 = vadd.xlane.f32.xlu0 %v166_v23 }
  0x4f   :  { %176 = vadd.xlane.f32.xlu1 %v175_v30  ;;  %173 = vadd.xlane.f32.xlu0 %v172_v31 }
  0x53   :  { %182 = vadd.xlane.f32.xlu1 %v181_v38  ;;  %179 = vadd.xlane.f32.xlu0 %v178_v39 }
  0x57   :  { %185 = vadd.xlane.f32.xlu0 %v184_v43 }
  0x8c   :  { %v60_v47 = vpop.xlane.xlu0 %59  ;;  %v66_v50 = vpop.xlane.xlu1 %65 }
  0x8d   :  { %v230_v51 = vmul.f32 0.020408163, %v60_v47  ;;  %v232_v54 = vmul.f32 0.020408163, %v66_v50 }
  0x8f   :  { %v1764_v55 = vsub.f32 %v1465_v0, %v230_v51  ;;  %v1767_v58 = vsub.f32 %v1470_v1, %v232_v54 }
  0x90   :  { %v63_v59 = vpop.xlane.xlu0 %62  ;;  %v69_v62 = vpop.xlane.xlu1 %68 }
  0x91   :  { %v231_v63 = vmul.f32 0.020408163, %v63_v59  ;;  %v233_v6 = vmul.f32 0.020408163, %v69_v62  ;;  %v316_v7 = vmul.f32 %v1764_v55, %v1764_v55  ;;  %v318_v14 = vmul.f32 %v1767_v58, %v1767_v58 }
  0x93   :  { %v1774_v15 = vsub.f32 %v1475_v2, %v231_v63  ;;  %v1777_v22 = vsub.f32 %v1484_v5, %v233_v6  ;;  %v359_v0 = vsel %vm57_vm0, %v316_v7, 0.0  ;;  %v365_v23 = vsel %vm57_vm0, %v318_v14, 0.0 }
  0x94   :  { %360 = vadd.xlane.f32.xlu1 %v359_v0  ;;  %v75_v1 = vpop.xlane.xlu1 %74  ;;  %v72_v30 = vpop.xlane.xlu0 %71 }
  0x95   :  { %v235_v31 = vmul.f32 0.020408163, %v75_v1  ;;  %v317_v38 = vmul.f32 %v1774_v15, %v1774_v15  ;;  %v319_v39 = vmul.f32 %v1777_v22, %v1777_v22  ;;  %v234_v43 = vmul.f32 0.020408163, %v72_v30 }
  0x97   :  { %v1786_v2 = vsub.f32 %v1493_v8, %v235_v31  ;;  %v362_v5 = vsel %vm57_vm0, %v317_v38, 0.0  ;;  %v1790_v46 = vsub.f32 %v1498_v9, %v234_v43  ;;  %v368_v50 = vsel %vm57_vm0, %v319_v39, 0.0 }
  0x98   :  { %363 = vadd.xlane.f32.xlu0 %v362_v5  ;;  %v81_v47 = vpop.xlane.xlu1 %80  ;;  %366 = vadd.xlane.f32.xlu1 %v365_v23  ;;  %v78_v51 = vpop.xlane.xlu0 %77 }
  0x99   :  { %v237_v54 = vmul.f32 0.020408163, %v81_v47  ;;  %v321_v59 = vmul.f32 %v1786_v2, %v1786_v2  ;;  %v320_v62 = vmul.f32 %v1790_v46, %v1790_v46  ;;  %v236_v8 = vmul.f32 0.020408163, %v78_v51 }
  0x9b   :  { %v1798_v63 = vsub.f32 %v1507_v12, %v237_v54  ;;  %v371_v9 = vsel %vm57_vm0, %v320_v62, 0.0  ;;  %v1802_v6 = vsub.f32 %v1512_v13, %v236_v8  ;;  %v374_v14 = vsel %vm57_vm0, %v321_v59, 0.0 }
  0x9c   :  { %369 = vadd.xlane.f32.xlu0 %v368_v50  ;;  %v87_v7 = vpop.xlane.xlu1 %86  ;;  %372 = vadd.xlane.f32.xlu1 %v371_v9  ;;  %v84_v0 = vpop.xlane.xlu0 %83 }
  0x9d   :  { %v239_v1 = vmul.f32 0.020408163, %v87_v7  ;;  %v323_v23 = vmul.f32 %v1798_v63, %v1798_v63  ;;  %v322_v30 = vmul.f32 %v1802_v6, %v1802_v6  ;;  %v238_v12 = vmul.f32 0.020408163, %v84_v0 }
  0x9f   :  { %v1810_v31 = vsub.f32 %v1521_v16, %v239_v1  ;;  %v377_v13 = vsel %vm57_vm0, %v322_v30, 0.0  ;;  %v1814_v38 = vsub.f32 %v1526_v17, %v238_v12  ;;  %v380_v43 = vsel %vm57_vm0, %v323_v23, 0.0 }
  0xa0   :  { %375 = vadd.xlane.f32.xlu0 %v374_v14  ;;  %v93_v39 = vpop.xlane.xlu1 %92  ;;  %378 = vadd.xlane.f32.xlu1 %v377_v13  ;;  %v90_v5 = vpop.xlane.xlu0 %89 }
  0xa1   :  { %v241_v47 = vmul.f32 0.020408163, %v93_v39  ;;  %v325_v50 = vmul.f32 %v1810_v31, %v1810_v31  ;;  %v240_v51 = vmul.f32 0.020408163, %v90_v5  ;;  %v324_v16 = vmul.f32 %v1814_v38, %v1814_v38 }
  0xa3   :  { %v1822_v54 = vsub.f32 %v1535_v20, %v241_v47  ;;  %v1825_v17 = vsub.f32 %v1540_v21, %v240_v51  ;;  %v383_v59 = vsel %vm57_vm0, %v324_v16, 0.0  ;;  %v386_v8 = vsel %vm57_vm0, %v325_v50, 0.0 }
  0xa4   :  { %381 = vadd.xlane.f32.xlu0 %v380_v43  ;;  %v99_v62 = vpop.xlane.xlu1 %98  ;;  %384 = vadd.xlane.f32.xlu1 %v383_v59  ;;  %v96_v9 = vpop.xlane.xlu0 %95 }
  0xa5   :  { %v243_v7 = vmul.f32 0.020408163, %v99_v62  ;;  %v327_v14 = vmul.f32 %v1822_v54, %v1822_v54  ;;  %v242_v0 = vmul.f32 0.020408163, %v96_v9  ;;  %v326_v20 = vmul.f32 %v1825_v17, %v1825_v17 }
  0xa7   :  { %v1834_v1 = vsub.f32 %v1549_v24, %v243_v7  ;;  %v1837_v21 = vsub.f32 %v1554_v25, %v242_v0  ;;  %v389_v23 = vsel %vm57_vm0, %v326_v20, 0.0  ;;  %v392_v12 = vsel %vm57_vm0, %v327_v14, 0.0 }
  0xa8   :  { %387 = vadd.xlane.f32.xlu0 %v386_v8  ;;  %v105_v30 = vpop.xlane.xlu1 %104  ;;  %390 = vadd.xlane.f32.xlu1 %v389_v23  ;;  %v102_v13 = vpop.xlane.xlu0 %101 }
  0xa9   :  { %v245_v39 = vmul.f32 0.020408163, %v105_v30  ;;  %v329_v43 = vmul.f32 %v1834_v1, %v1834_v1  ;;  %v244_v5 = vmul.f32 0.020408163, %v102_v13  ;;  %v328_v24 = vmul.f32 %v1837_v21, %v1837_v21 }
  0xab   :  { %v1846_v47 = vsub.f32 %v1563_v28, %v245_v39  ;;  %v1849_v25 = vsub.f32 %v1568_v29, %v244_v5  ;;  %v395_v50 = vsel %vm57_vm0, %v328_v24, 0.0  ;;  %v398_v16 = vsel %vm57_vm0, %v329_v43, 0.0 }
  0xac   :  { %393 = vadd.xlane.f32.xlu0 %v392_v12  ;;  %v111_v51 = vpop.xlane.xlu1 %110  ;;  %396 = vadd.xlane.f32.xlu1 %v395_v50  ;;  %v108_v59 = vpop.xlane.xlu0 %107 }
  0xad   :  { %v247_v62 = vmul.f32 0.020408163, %v111_v51  ;;  %v331_v8 = vmul.f32 %v1846_v47, %v1846_v47  ;;  %v246_v9 = vmul.f32 0.020408163, %v108_v59  ;;  %v330_v28 = vmul.f32 %v1849_v25, %v1849_v25 }
  0xaf   :  { %v1858_v7 = vsub.f32 %v1577_v32, %v247_v62  ;;  %v1861_v29 = vsub.f32 %v1582_v33, %v246_v9  ;;  %v401_v14 = vsel %vm57_vm0, %v330_v28, 0.0  ;;  %v404_v20 = vsel %vm57_vm0, %v331_v8, 0.0 }
  0xb0   :  { %399 = vadd.xlane.f32.xlu0 %v398_v16  ;;  %v117_v0 = vpop.xlane.xlu1 %116  ;;  %402 = vadd.xlane.f32.xlu1 %v401_v14  ;;  %v114_v23 = vpop.xlane.xlu0 %113 }
  0xb1   :  { %v249_v30 = vmul.f32 0.020408163, %v117_v0  ;;  %v333_v12 = vmul.f32 %v1858_v7, %v1858_v7  ;;  %v248_v13 = vmul.f32 0.020408163, %v114_v23  ;;  %v332_v32 = vmul.f32 %v1861_v29, %v1861_v29 }
  0xb3   :  { %v1870_v39 = vsub.f32 %v1591_v36, %v249_v30  ;;  %v1873_v33 = vsub.f32 %v1596_v37, %v248_v13  ;;  %v407_v43 = vsel %vm57_vm0, %v332_v32, 0.0  ;;  %v410_v24 = vsel %vm57_vm0, %v333_v12, 0.0 }
  0xb4   :  { %405 = vadd.xlane.f32.xlu0 %v404_v20  ;;  %v123_v5 = vpop.xlane.xlu1 %122  ;;  %408 = vadd.xlane.f32.xlu1 %v407_v43  ;;  %v120_v50 = vpop.xlane.xlu0 %119 }
  0xb5   :  { %v251_v51 = vmul.f32 0.020408163, %v123_v5  ;;  %v335_v16 = vmul.f32 %v1870_v39, %v1870_v39  ;;  %v250_v59 = vmul.f32 0.020408163, %v120_v50  ;;  %v334_v36 = vmul.f32 %v1873_v33, %v1873_v33 }
  0xb7   :  { %v1882_v62 = vsub.f32 %v1605_v40, %v251_v51  ;;  %v1885_v37 = vsub.f32 %v1610_v41, %v250_v59  ;;  %v413_v8 = vsel %vm57_vm0, %v334_v36, 0.0  ;;  %v416_v28 = vsel %vm57_vm0, %v335_v16, 0.0 }
  0xb8   :  { %411 = vadd.xlane.f32.xlu0 %v410_v24  ;;  %v129_v9 = vpop.xlane.xlu1 %128  ;;  %414 = vadd.xlane.f32.xlu1 %v413_v8  ;;  %v126_v14 = vpop.xlane.xlu0 %125 }
  0xb9   :  { %v253_v0 = vmul.f32 0.020408163, %v129_v9  ;;  %v337_v20 = vmul.f32 %v1882_v62, %v1882_v62  ;;  %v252_v23 = vmul.f32 0.020408163, %v126_v14  ;;  %v336_v40 = vmul.f32 %v1885_v37, %v1885_v37 }
  0xbb   :  { %v1894_v30 = vsub.f32 %v1619_v44, %v253_v0  ;;  %v1897_v41 = vsub.f32 %v1624_v45, %v252_v23  ;;  %v419_v12 = vsel %vm57_vm0, %v336_v40, 0.0  ;;  %v422_v32 = vsel %vm57_vm0, %v337_v20, 0.0 }
  0xbc   :  { %417 = vadd.xlane.f32.xlu0 %v416_v28  ;;  %v135_v13 = vpop.xlane.xlu1 %134  ;;  %420 = vadd.xlane.f32.xlu1 %v419_v12  ;;  %v132_v43 = vpop.xlane.xlu0 %131 }
  0xbd   :  { %v255_v5 = vmul.f32 0.020408163, %v135_v13  ;;  %v339_v24 = vmul.f32 %v1894_v30, %v1894_v30  ;;  %v254_v50 = vmul.f32 0.020408163, %v132_v43  ;;  %v338_v44 = vmul.f32 %v1897_v41, %v1897_v41 }
  0xbf   :  { %v1906_v51 = vsub.f32 %v1633_v48, %v255_v5  ;;  %v1909_v45 = vsub.f32 %v1638_v49, %v254_v50  ;;  %v425_v16 = vsel %vm57_vm0, %v338_v44, 0.0  ;;  %v428_v36 = vsel %vm57_vm0, %v339_v24, 0.0 }
  0xc0   :  { %423 = vadd.xlane.f32.xlu0 %v422_v32  ;;  %v141_v59 = vpop.xlane.xlu1 %140  ;;  %426 = vadd.xlane.f32.xlu1 %v425_v16  ;;  %v138_v8 = vpop.xlane.xlu0 %137 }
  0xc1   :  { %v257_v9 = vmul.f32 0.020408163, %v141_v59  ;;  %v341_v28 = vmul.f32 %v1906_v51, %v1906_v51  ;;  %v256_v14 = vmul.f32 0.020408163, %v138_v8  ;;  %v340_v48 = vmul.f32 %v1909_v45, %v1909_v45 }
  0xc3   :  { %v1918_v0 = vsub.f32 %v1647_v52, %v257_v9  ;;  %v1921_v49 = vsub.f32 %v1652_v53, %v256_v14  ;;  %v431_v20 = vsel %vm57_vm0, %v340_v48, 0.0  ;;  %v434_v40 = vsel %vm57_vm0, %v341_v28, 0.0 }
  0xc4   :  { %429 = vadd.xlane.f32.xlu0 %v428_v36  ;;  %v147_v23 = vpop.xlane.xlu1 %146  ;;  %432 = vadd.xlane.f32.xlu1 %v431_v20  ;;  %v144_v12 = vpop.xlane.xlu0 %143 }
  0xc5   :  { %v259_v13 = vmul.f32 0.020408163, %v147_v23  ;;  %v343_v32 = vmul.f32 %v1918_v0, %v1918_v0  ;;  %v258_v43 = vmul.f32 0.020408163, %v144_v12  ;;  %v342_v52 = vmul.f32 %v1921_v49, %v1921_v49 }
  0xc7   :  { %v1930_v5 = vsub.f32 %v1661_v56, %v259_v13  ;;  %v1933_v53 = vsub.f32 %v1666_v57, %v258_v43  ;;  %v437_v24 = vsel %vm57_vm0, %v342_v52, 0.0  ;;  %v440_v44 = vsel %vm57_vm0, %v343_v32, 0.0 }
  0xc8   :  { %435 = vadd.xlane.f32.xlu0 %v434_v40  ;;  %v153_v50 = vpop.xlane.xlu1 %152  ;;  %438 = vadd.xlane.f32.xlu1 %v437_v24  ;;  %v150_v16 = vpop.xlane.xlu0 %149 }
  0xc9   :  { %v261_v59 = vmul.f32 0.020408163, %v153_v50  ;;  %v345_v36 = vmul.f32 %v1930_v5, %v1930_v5  ;;  %v260_v8 = vmul.f32 0.020408163, %v150_v16  ;;  %v344_v56 = vmul.f32 %v1933_v53, %v1933_v53 }
  0xcb   :  { %v1942_v9 = vsub.f32 %v1675_v60, %v261_v59  ;;  %v1945_v57 = vsub.f32 %v1680_v61, %v260_v8  ;;  %v443_v28 = vsel %vm57_vm0, %v344_v56, 0.0  ;;  %v446_v48 = vsel %vm57_vm0, %v345_v36, 0.0 }
  0xcc   :  { %441 = vadd.xlane.f32.xlu0 %v440_v44  ;;  %v159_v14 = vpop.xlane.xlu1 %158  ;;  %444 = vadd.xlane.f32.xlu1 %v443_v28  ;;  %v156_v20 = vpop.xlane.xlu0 %155 }
  0xcd   :  { %v263_v23 = vmul.f32 0.020408163, %v159_v14  ;;  %v347_v40 = vmul.f32 %v1942_v9, %v1942_v9  ;;  %v262_v12 = vmul.f32 0.020408163, %v156_v20  ;;  %v346_v60 = vmul.f32 %v1945_v57, %v1945_v57 }
  0xcf   :  { %v1954_v13 = vsub.f32 %v1689_v3, %v263_v23  ;;  %v1957_v61 = vsub.f32 %v1694_v4, %v262_v12  ;;  %v449_v32 = vsel %vm57_vm0, %v346_v60, 0.0  ;;  %v452_v52 = vsel %vm57_vm0, %v347_v40, 0.0 }
  0xd0   :  { %447 = vadd.xlane.f32.xlu0 %v446_v48  ;;  %v165_v43 = vpop.xlane.xlu1 %164  ;;  %450 = vadd.xlane.f32.xlu1 %v449_v32  ;;  %v162_v24 = vpop.xlane.xlu0 %161 }
  0xd1   :  { %v265_v50 = vmul.f32 0.020408163, %v165_v43  ;;  %v349_v44 = vmul.f32 %v1954_v13, %v1954_v13  ;;  %v264_v16 = vmul.f32 0.020408163, %v162_v24  ;;  %v348_v3 = vmul.f32 %v1957_v61, %v1957_v61 }
  0xd3   :  { %v1966_v59 = vsub.f32 %v1703_v10, %v265_v50  ;;  %v1969_v4 = vsub.f32 %v1708_v11, %v264_v16  ;;  %v455_v36 = vsel %vm57_vm0, %v348_v3, 0.0  ;;  %v458_v56 = vsel %vm57_vm0, %v349_v44, 0.0 }
  0xd4   :  { %453 = vadd.xlane.f32.xlu0 %v452_v52  ;;  %v171_v8 = vpop.xlane.xlu1 %170  ;;  %456 = vadd.xlane.f32.xlu1 %v455_v36  ;;  %v168_v28 = vpop.xlane.xlu0 %167 }
  0xd5   :  { %v267_v14 = vmul.f32 0.020408163, %v171_v8  ;;  %v351_v48 = vmul.f32 %v1966_v59, %v1966_v59  ;;  %v266_v20 = vmul.f32 0.020408163, %v168_v28  ;;  %v350_v10 = vmul.f32 %v1969_v4, %v1969_v4 }
  0xd7   :  { %v1978_v23 = vsub.f32 %v1717_v18, %v267_v14  ;;  %v1981_v11 = vsub.f32 %v1722_v19, %v266_v20  ;;  %v461_v40 = vsel %vm57_vm0, %v350_v10, 0.0  ;;  %v464_v60 = vsel %vm57_vm0, %v351_v48, 0.0 }
  0xd8   :  { %459 = vadd.xlane.f32.xlu0 %v458_v56  ;;  %v177_v12 = vpop.xlane.xlu1 %176  ;;  %462 = vadd.xlane.f32.xlu1 %v461_v40  ;;  %v174_v32 = vpop.xlane.xlu0 %173 }
  0xd9   :  { %v269_v43 = vmul.f32 0.020408163, %v177_v12  ;;  %v353_v52 = vmul.f32 %v1978_v23, %v1978_v23  ;;  %v268_v24 = vmul.f32 0.020408163, %v174_v32  ;;  %v352_v18 = vmul.f32 %v1981_v11, %v1981_v11 }
  0xdb   :  { %v1990_v50 = vsub.f32 %v1731_v26, %v269_v43  ;;  %v1993_v19 = vsub.f32 %v1736_v27, %v268_v24  ;;  %v467_v44 = vsel %vm57_vm0, %v352_v18, 0.0  ;;  %v470_v3 = vsel %vm57_vm0, %v353_v52, 0.0  ;;  %v1005_v24 = vld [vmem:[%s2582_s2 + $0x8] sm:$0xff]  ;;  %v1004_v18 = vld [vmem:[%s2582_s2] sm:$0xff] }
  0xdc   :  { %465 = vadd.xlane.f32.xlu0 %v464_v60  ;;  %v183_v16 = vpop.xlane.xlu1 %182  ;;  %468 = vadd.xlane.f32.xlu1 %v467_v44  ;;  %v180_v36 = vpop.xlane.xlu0 %179  ;;  %v1009_v44 = vld [vmem:[%s2582_s2 + $0x28] sm:$0xff] }
  0xdd   :  { %2587 = vst [vmem:[#allocation2_spill] sm:$0xff] %v1990_v50  ;;  %v271_v8 = vmul.f32 0.020408163, %v183_v16  ;;  %v355_v56 = vmul.f32 %v1990_v50, %v1990_v50  ;;  %v270_v28 = vmul.f32 0.020408163, %v180_v36  ;;  %v354_v26 = vmul.f32 %v1993_v19, %v1993_v19  ;;  %v1006_v16 = vld [vmem:[%s2582_s2 + $0x10] sm:$0xff] }
  0xde   :  { %v1008_v36 = vld [vmem:[%s2582_s2 + $0x20] sm:$0xff] }
  0xdf   :  { %v2002_v14 = vsub.f32 %v1745_v34, %v271_v8  ;;  %v2005_v27 = vsub.f32 %v1750_v35, %v270_v28  ;;  %v473_v48 = vsel %vm57_vm0, %v354_v26, 0.0  ;;  %v476_v10 = vsel %vm57_vm0, %v355_v56, 0.0  ;;  %v1013_v8 = vld [vmem:[%s2582_s2 + $0x48] sm:$0xff]  ;;  %v1010_v56 = vld [vmem:[%s2582_s2 + $0x30] sm:$0xff]  ;;  %v1015_v28 = vld [vmem:[%s2582_s2 + $0x58] sm:$0xff] }
  0xe0   :  { %471 = vadd.xlane.f32.xlu0 %v470_v3  ;;  %474 = vadd.xlane.f32.xlu1 %v473_v48  ;;  %v186_v20 = vpop.xlane.xlu0 %185  ;;  %v1011_v3 = vld [vmem:[%s2582_s2 + $0x38] sm:$0xff]  ;;  %v1012_v26 = vld [vmem:[%s2582_s2 + $0x40] sm:$0xff]  ;;  %v1014_v48 = vld [vmem:[%s2582_s2 + $0x50] sm:$0xff] }
  0xe1   :  { %2588 = vst [vmem:[#allocation3_spill] sm:$0xff] %v2002_v14  ;;  %v357_v40 = vmul.f32 %v2002_v14, %v2002_v14  ;;  %v272_v12 = vmul.f32 0.020408163, %v186_v20  ;;  %v356_v60 = vmul.f32 %v2005_v27, %v2005_v27 }
  0xe3   :  { %v2014_v34 = vsub.f32 %v1759_v42, %v272_v12  ;;  %v479_v35 = vsel %vm57_vm0, %v356_v60, 0.0  ;;  %v482_v32 = vsel %vm57_vm0, %v357_v40, 0.0  ;;  %v1007_v42 = vld [vmem:[%s2582_s2 + $0x18] sm:$0xff] }
  0xe4   :  { %477 = vadd.xlane.f32.xlu0 %v476_v10  ;;  %480 = vadd.xlane.f32.xlu1 %v479_v35 }
  0xe5   :  { %v358_v43 = vmul.f32 %v2014_v34, %v2014_v34 }
  0xe7   :  { %v485_v52 = vsel %vm57_vm0, %v358_v43, 0.0 }
  0xe8   :  { %483 = vadd.xlane.f32.xlu0 %v482_v32  ;;  %486 = vadd.xlane.f32.xlu1 %v485_v52 }
  0xf9   :  { %1054 = vperm.xlu1 %1354, %v1005_v24  }
  0xfd   :  { %1064 = vperm.xlu1 %1354, %v1007_v42  }
  0xfe   :  { %1049 = vperm.xlu0 %1353, %v1004_v18  }
 0x101   :  { %1074 = vperm.xlu1 %1354, %v1009_v44  }
 0x102   :  { %1059 = vperm.xlu0 %1353, %v1006_v16  }
 0x105   :  { %1084 = vperm.xlu1 %1354, %v1011_v3  }
 0x106   :  { %1069 = vperm.xlu0 %1353, %v1008_v36  }
 0x109   :  { %1094 = vperm.xlu1 %1354, %v1013_v8  }
 0x10a   :  { %1079 = vperm.xlu0 %1353, %v1010_v56  }
 0x10d   :  { %1104 = vperm.xlu1 %1354, %v1015_v28  }
 0x10e   :  { %1089 = vperm.xlu0 %1353, %v1012_v26   ;;  %v660_v26 = vld [vmem:[%s2583_s1] sm:$0xff] }
 0x112   :  { %1099 = vperm.xlu0 %1353, %v1014_v48  }
 0x11d   :  { %v361_v20 = vpop.xlane.xlu1 %360 }
 0x11e   :  { %v531_v10 = vmul.f32 0.020408163, %v361_v20 }
 0x120   :  { %v574_v40 = vadd.f32 1e-05, %v531_v10 }
 0x121   :  { %v364_v12 = vpop.xlane.xlu0 %363  ;;  %v367_v60 = vpop.xlane.xlu1 %366 }
 0x122   :  { %1355 = vrsqrt.f32 %v574_v40  ;;  %v532_v35 = vmul.f32 0.020408163, %v364_v12  ;;  %v533_v32 = vmul.f32 0.020408163, %v367_v60 }
 0x124   :  { %v575_v43 = vadd.f32 1e-05, %v532_v35  ;;  %v576_v52 = vadd.f32 1e-05, %v533_v32 }
 0x125   :  { %v370_v24 = vpop.xlane.xlu0 %369  ;;  %v373_v42 = vpop.xlane.xlu1 %372 }
 0x126   :  { %1357 = vrsqrt.f32 %v575_v43  ;;  %v534_v18 = vmul.f32 0.020408163, %v370_v24  ;;  %v535_v44 = vmul.f32 0.020408163, %v373_v42  ;;  %v661_v43 = vld [vmem:[%s2583_s1 + $0x8] sm:$0xff] }
 0x127   :  { %1359 = vrsqrt.f32 %v576_v52 }
 0x128   :  { %v577_v16 = vadd.f32 1e-05, %v534_v18  ;;  %v578_v56 = vadd.f32 1e-05, %v535_v44  ;;  %v662_v18 = vld [vmem:[%s2583_s1 + $0x10] sm:$0xff] }
 0x129   :  { %v376_v3 = vpop.xlane.xlu0 %375  ;;  %v379_v36 = vpop.xlane.xlu1 %378 }
 0x12a   :  { %1361 = vrsqrt.f32 %v577_v16  ;;  %v536_v8 = vmul.f32 0.020408163, %v376_v3  ;;  %v537_v48 = vmul.f32 0.020408163, %v379_v36 }
 0x12b   :  { %1363 = vrsqrt.f32 %v578_v56 }
 0x12c   :  { %v579_v10 = vadd.f32 1e-05, %v536_v8  ;;  %v580_v32 = vadd.f32 1e-05, %v537_v48 }
 0x12d   :  { %v382_v28 = vpop.xlane.xlu0 %381  ;;  %v385_v20 = vpop.xlane.xlu1 %384 }
 0x12e   :  { %v538_v60 = vmul.f32 0.020408163, %v382_v28  ;;  %1365 = vrsqrt.f32 %v579_v10  ;;  %v539_v56 = vmul.f32 0.020408163, %v385_v20 }
 0x12f   :  { %v1356_v40 = vpop.eup %1355  ;;  %1367 = vrsqrt.f32 %v580_v32 }
 0x130   :  { %v703_v12 = vmul.f32 %v1356_v40, %v660_v26  ;;  %v581_v36 = vadd.f32 1e-05, %v538_v60  ;;  %v663_v40 = vld [vmem:[%s2583_s1 + $0x18] sm:$0xff]  ;;  %v582_v14 = vadd.f32 1e-05, %v539_v56 }
 0x131   :  { %v388_v35 = vpop.xlane.xlu0 %387  ;;  %v391_v52 = vpop.xlane.xlu1 %390 }
 0x132   :  { %v540_v24 = vmul.f32 0.020408163, %v388_v35  ;;  %748 = vperm.xlu0 %1353, %v703_v12  }
 0x133   :  { %v1358_v42 = vpop.eup %1357 }
 0x134   :  { %v1360_v44 = vpop.eup %1359  ;;  %v583_v16 = vadd.f32 1e-05, %v540_v24  ;;  %v704_v3 = vmul.f32 %v1358_v42, %v661_v43  ;;  %v541_v24 = vmul.f32 0.020408163, %v391_v52  ;;  %v664_v42 = vld [vmem:[%s2583_s1 + $0x20] sm:$0xff] }
 0x135   :  { %v394_v8 = vpop.xlane.xlu0 %393  ;;  %v397_v28 = vpop.xlane.xlu1 %396  ;;  %v705_v48 = vmul.f32 %v1360_v44, %v662_v18 }
 0x136   :  { %1369 = vrsqrt.f32 %v583_v16  ;;  %v542_v26 = vmul.f32 0.020408163, %v394_v8  ;;  %753 = vperm.xlu1 %1354, %v704_v3   ;;  %v584_v16 = vadd.f32 1e-05, %v541_v24  ;;  %v543_v3 = vmul.f32 0.020408163, %v397_v28 }
 0x137   :  { %v1362_v10 = vpop.eup %1361  ;;  %1371 = vrsqrt.f32 %v581_v36 }
 0x138   :  { %v585_v12 = vadd.f32 1e-05, %v542_v26  ;;  %v706_v20 = vmul.f32 %v1362_v10, %v663_v40  ;;  %v1364_v32 = vpop.eup %1363  ;;  %v665_v26 = vld [vmem:[%s2583_s1 + $0x28] sm:$0xff]  ;;  %v586_v40 = vadd.f32 1e-05, %v543_v3 }
 0x139   :  { %v400_v35 = vpop.xlane.xlu0 %399  ;;  %v403_v43 = vpop.xlane.xlu1 %402  ;;  %v707_v52 = vmul.f32 %v1364_v32, %v664_v42  ;;  %v666_v32 = vld [vmem:[%s2583_s1 + $0x30] sm:$0xff] }
 0x13a   :  { %1373 = vrsqrt.f32 %v585_v12  ;;  %v544_v60 = vmul.f32 0.020408163, %v400_v35  ;;  %758 = vperm.xlu1 %1354, %v705_v48   ;;  %v545_v12 = vmul.f32 0.020408163, %v403_v43  ;;  %v671_v43 = vld [vmem:[%s2583_s1 + $0x58] sm:$0xff] }
 0x13b   :  { %1375 = vrsqrt.f32 %v582_v14  ;;  %v1366_v56 = vpop.eup %1365  ;;  %v669_v14 = vld [vmem:[%s2583_s1 + $0x48] sm:$0xff] }
 0x13c   :  { %v587_v18 = vadd.f32 1e-05, %v544_v60  ;;  %v1368_v35 = vpop.eup %1367  ;;  %v708_v60 = vmul.f32 %v1366_v56, %v665_v26 }
 0x13d   :  { %v406_v44 = vpop.xlane.xlu0 %405  ;;  %v409_v8 = vpop.xlane.xlu1 %408  ;;  %v709_v56 = vmul.f32 %v1368_v35, %v666_v32 }
 0x13e   :  { %1377 = vrsqrt.f32 %v587_v18  ;;  %v546_v36 = vmul.f32 0.020408163, %v406_v44  ;;  %763 = vperm.xlu1 %1354, %v706_v20   ;;  %v547_v3 = vmul.f32 0.020408163, %v409_v8  ;;  %v673_v8 = vld [vmem:[%s2583_s1 + $0x68] sm:$0xff] }
 0x13f   :  { %1379 = vrsqrt.f32 %v584_v16  ;;  %v588_v16 = vadd.f32 1e-05, %v545_v12 }
 0x140   :  { %v589_v48 = vadd.f32 1e-05, %v546_v36 }
 0x141   :  { %v412_v10 = vpop.xlane.xlu0 %411  ;;  %v415_v28 = vpop.xlane.xlu1 %414 }
 0x142   :  { %1381 = vrsqrt.f32 %v589_v48  ;;  %v548_v24 = vmul.f32 0.020408163, %v412_v10  ;;  %768 = vperm.xlu1 %1354, %v707_v52   ;;  %v667_v10 = vld [vmem:[%s2583_s1 + $0x38] sm:$0xff] }
 0x143   :  { %v1370_v20 = vpop.eup %1369  ;;  %1383 = vrsqrt.f32 %v586_v40 }
 0x144   :  { %v591_v42 = vadd.f32 1e-05, %v548_v24  ;;  %v712_v18 = vmul.f32 %v1370_v20, %v669_v14  ;;  %v1372_v48 = vpop.eup %1371  ;;  %v590_v24 = vadd.f32 1e-05, %v547_v3  ;;  %v549_v20 = vmul.f32 0.020408163, %v415_v28 }
 0x145   :  { %v418_v44 = vpop.xlane.xlu0 %417  ;;  %v421_v36 = vpop.xlane.xlu1 %420  ;;  %v710_v35 = vmul.f32 %v1372_v48, %v667_v10  ;;  %v675_v28 = vld [vmem:[%s2583_s1 + $0x78] sm:$0xff] }
 0x146   :  { %1385 = vrsqrt.f32 %v591_v42  ;;  %v550_v52 = vmul.f32 0.020408163, %v418_v44  ;;  %773 = vperm.xlu1 %1354, %v708_v60   ;;  %793 = vperm.xlu0 %1353, %v712_v18   ;;  %v668_v18 = vld [vmem:[%s2583_s1 + $0x40] sm:$0xff] }
 0x147   :  { %v1374_v26 = vpop.eup %1373  ;;  %1387 = vrsqrt.f32 %v588_v16 }
 0x148   :  { %v593_v40 = vadd.f32 1e-05, %v550_v52  ;;  %v714_v14 = vmul.f32 %v1374_v26, %v671_v43  ;;  %v1376_v44 = vpop.eup %1375  ;;  %v592_v52 = vadd.f32 1e-05, %v549_v20  ;;  %v551_v26 = vmul.f32 0.020408163, %v421_v36 }
 0x149   :  { %v424_v12 = vpop.xlane.xlu0 %423  ;;  %v427_v42 = vpop.xlane.xlu1 %426  ;;  %v711_v48 = vmul.f32 %v1376_v44, %v668_v18  ;;  %v677_v36 = vld [vmem:[%s2583_s1 + $0x88] sm:$0xff] }
 0x14a   :  { %1389 = vrsqrt.f32 %v593_v40  ;;  %v552_v60 = vmul.f32 0.020408163, %v424_v12  ;;  %778 = vperm.xlu1 %1354, %v709_v56   ;;  %803 = vperm.xlu0 %1353, %v714_v14   ;;  %v670_v14 = vld [vmem:[%s2583_s1 + $0x50] sm:$0xff] }
 0x14b   :  { %v1378_v32 = vpop.eup %1377  ;;  %1391 = vrsqrt.f32 %v590_v24 }
 0x14c   :  { %v595_v16 = vadd.f32 1e-05, %v552_v60  ;;  %v716_v43 = vmul.f32 %v1378_v32, %v673_v8  ;;  %v1380_v12 = vpop.eup %1379  ;;  %v594_v60 = vadd.f32 1e-05, %v551_v26  ;;  %v553_v32 = vmul.f32 0.020408163, %v427_v42 }
 0x14d   :  { %v430_v3 = vpop.xlane.xlu0 %429  ;;  %v433_v40 = vpop.xlane.xlu1 %432  ;;  %v713_v44 = vmul.f32 %v1380_v12, %v670_v14  ;;  %v679_v42 = vld [vmem:[%s2583_s1 + $0x98] sm:$0xff] }
 0x14e   :  { %1393 = vrsqrt.f32 %v595_v16  ;;  %v554_v56 = vmul.f32 0.020408163, %v430_v3  ;;  %783 = vperm.xlu1 %1354, %v710_v35   ;;  %813 = vperm.xlu0 %1353, %v716_v43   ;;  %v672_v43 = vld [vmem:[%s2583_s1 + $0x60] sm:$0xff] }
 0x14f   :  { %v1382_v10 = vpop.eup %1381  ;;  %1395 = vrsqrt.f32 %v592_v52 }
 0x150   :  { %v597_v24 = vadd.f32 1e-05, %v554_v56  ;;  %v718_v8 = vmul.f32 %v1382_v10, %v675_v28  ;;  %v1384_v3 = vpop.eup %1383  ;;  %v596_v56 = vadd.f32 1e-05, %v553_v32  ;;  %v555_v10 = vmul.f32 0.020408163, %v433_v40 }
 0x151   :  { %v436_v20 = vpop.xlane.xlu0 %435  ;;  %v439_v16 = vpop.xlane.xlu1 %438  ;;  %v715_v12 = vmul.f32 %v1384_v3, %v672_v43  ;;  %v681_v40 = vld [vmem:[%s2583_s1 + $0xa8] sm:$0xff] }
 0x152   :  { %1397 = vrsqrt.f32 %v597_v24  ;;  %v556_v35 = vmul.f32 0.020408163, %v436_v20  ;;  %788 = vperm.xlu1 %1354, %v711_v48   ;;  %823 = vperm.xlu0 %1353, %v718_v8   ;;  %v674_v8 = vld [vmem:[%s2583_s1 + $0x70] sm:$0xff] }
 0x153   :  { %v1386_v18 = vpop.eup %1385  ;;  %1399 = vrsqrt.f32 %v594_v60 }
 0x154   :  { %v599_v52 = vadd.f32 1e-05, %v556_v35  ;;  %v720_v28 = vmul.f32 %v1386_v18, %v677_v36  ;;  %v1388_v20 = vpop.eup %1387  ;;  %v598_v35 = vadd.f32 1e-05, %v555_v10  ;;  %v557_v18 = vmul.f32 0.020408163, %v439_v16 }
 0x155   :  { %v442_v26 = vpop.xlane.xlu0 %441  ;;  %v445_v24 = vpop.xlane.xlu1 %444  ;;  %v717_v3 = vmul.f32 %v1388_v20, %v674_v8  ;;  %v683_v16 = vld [vmem:[%s2583_s1 + $0xb8] sm:$0xff] }
 0x156   :  { %1401 = vrsqrt.f32 %v599_v52  ;;  %v558_v48 = vmul.f32 0.020408163, %v442_v26  ;;  %798 = vperm.xlu1 %1354, %v713_v44   ;;  %833 = vperm.xlu0 %1353, %v720_v28   ;;  %v676_v28 = vld [vmem:[%s2583_s1 + $0x80] sm:$0xff] }
 0x157   :  { %v1390_v14 = vpop.eup %1389  ;;  %1403 = vrsqrt.f32 %v596_v56 }
 0x158   :  { %v601_v60 = vadd.f32 1e-05, %v558_v48  ;;  %v722_v36 = vmul.f32 %v1390_v14, %v679_v42  ;;  %v1392_v26 = vpop.eup %1391  ;;  %v600_v48 = vadd.f32 1e-05, %v557_v18  ;;  %v559_v14 = vmul.f32 0.020408163, %v445_v24 }
 0x159   :  { %v448_v32 = vpop.xlane.xlu0 %447  ;;  %v451_v52 = vpop.xlane.xlu1 %450  ;;  %v719_v20 = vmul.f32 %v1392_v26, %v676_v28  ;;  %v685_v24 = vld [vmem:[%s2583_s1 + $0xc8] sm:$0xff] }
 0x15a   :  { %1405 = vrsqrt.f32 %v601_v60  ;;  %v560_v44 = vmul.f32 0.020408163, %v448_v32  ;;  %808 = vperm.xlu1 %1354, %v715_v12   ;;  %843 = vperm.xlu0 %1353, %v722_v36   ;;  %v678_v36 = vld [vmem:[%s2583_s1 + $0x90] sm:$0xff] }
 0x15b   :  { %v1394_v43 = vpop.eup %1393  ;;  %1407 = vrsqrt.f32 %v598_v35 }
 0x15c   :  { %v603_v56 = vadd.f32 1e-05, %v560_v44  ;;  %v724_v42 = vmul.f32 %v1394_v43, %v681_v40  ;;  %v1396_v32 = vpop.eup %1395  ;;  %v602_v44 = vadd.f32 1e-05, %v559_v14  ;;  %v561_v43 = vmul.f32 0.020408163, %v451_v52 }
 0x15d   :  { %v454_v10 = vpop.xlane.xlu0 %453  ;;  %v457_v60 = vpop.xlane.xlu1 %456  ;;  %v721_v26 = vmul.f32 %v1396_v32, %v678_v36  ;;  %v687_v52 = vld [vmem:[%s2583_s1 + $0xd8] sm:$0xff] }
 0x15e   :  { %1409 = vrsqrt.f32 %v603_v56  ;;  %v562_v12 = vmul.f32 0.020408163, %v454_v10  ;;  %818 = vperm.xlu1 %1354, %v717_v3   ;;  %853 = vperm.xlu0 %1353, %v724_v42   ;;  %v680_v42 = vld [vmem:[%s2583_s1 + $0xa0] sm:$0xff] }
 0x15f   :  { %v1398_v8 = vpop.eup %1397  ;;  %1411 = vrsqrt.f32 %v600_v48 }
 0x160   :  { %v605_v35 = vadd.f32 1e-05, %v562_v12  ;;  %v726_v40 = vmul.f32 %v1398_v8, %v683_v16  ;;  %v1400_v10 = vpop.eup %1399  ;;  %v604_v12 = vadd.f32 1e-05, %v561_v43  ;;  %v563_v8 = vmul.f32 0.020408163, %v457_v60 }
 0x161   :  { %v460_v18 = vpop.xlane.xlu0 %459  ;;  %v463_v56 = vpop.xlane.xlu1 %462  ;;  %v723_v32 = vmul.f32 %v1400_v10, %v680_v42  ;;  %v689_v60 = vld [vmem:[%s2583_s1 + $0xe8] sm:$0xff] }
 0x162   :  { %1413 = vrsqrt.f32 %v605_v35  ;;  %v564_v3 = vmul.f32 0.020408163, %v460_v18  ;;  %828 = vperm.xlu1 %1354, %v719_v20   ;;  %863 = vperm.xlu0 %1353, %v726_v40   ;;  %v682_v40 = vld [vmem:[%s2583_s1 + $0xb0] sm:$0xff] }
 0x163   :  { %v1402_v28 = vpop.eup %1401  ;;  %1415 = vrsqrt.f32 %v602_v44 }
 0x164   :  { %v607_v48 = vadd.f32 1e-05, %v564_v3  ;;  %v728_v16 = vmul.f32 %v1402_v28, %v685_v24  ;;  %v1404_v18 = vpop.eup %1403  ;;  %v606_v3 = vadd.f32 1e-05, %v563_v8  ;;  %v565_v28 = vmul.f32 0.020408163, %v463_v56 }
 0x165   :  { %v466_v14 = vpop.xlane.xlu0 %465  ;;  %v469_v35 = vpop.xlane.xlu1 %468  ;;  %v725_v10 = vmul.f32 %v1404_v18, %v682_v40  ;;  %v691_v56 = vld [vmem:[%s2583_s1 + $0xf8] sm:$0xff] }
 0x166   :  { %1417 = vrsqrt.f32 %v607_v48  ;;  %v566_v20 = vmul.f32 0.020408163, %v466_v14  ;;  %838 = vperm.xlu1 %1354, %v721_v26   ;;  %873 = vperm.xlu0 %1353, %v728_v16   ;;  %v684_v16 = vld [vmem:[%s2583_s1 + $0xc0] sm:$0xff] }
 0x167   :  { %v1406_v36 = vpop.eup %1405  ;;  %1419 = vrsqrt.f32 %v604_v12 }
 0x168   :  { %v609_v44 = vadd.f32 1e-05, %v566_v20  ;;  %v730_v24 = vmul.f32 %v1406_v36, %v687_v52  ;;  %v1408_v48 = vpop.eup %1407  ;;  %v608_v20 = vadd.f32 1e-05, %v565_v28  ;;  %v567_v36 = vmul.f32 0.020408163, %v469_v35 }
 0x169   :  { %v472_v43 = vpop.xlane.xlu0 %471  ;;  %v475_v14 = vpop.xlane.xlu1 %474  ;;  %v727_v18 = vmul.f32 %v1408_v48, %v684_v16  ;;  %v693_v35 = vld [vmem:[%s2583_s1 + $0x108] sm:$0xff] }
 0x16a   :  { %1421 = vrsqrt.f32 %v609_v44  ;;  %v568_v26 = vmul.f32 0.020408163, %v472_v43  ;;  %848 = vperm.xlu1 %1354, %v723_v32   ;;  %883 = vperm.xlu0 %1353, %v730_v24   ;;  %v686_v24 = vld [vmem:[%s2583_s1 + $0xd0] sm:$0xff]  ;;  %v610_v28 = vadd.f32 1e-05, %v567_v36 }
 0x16b   :  { %v1410_v42 = vpop.eup %1409  ;;  %1423 = vrsqrt.f32 %v606_v3  ;;  %v569_v16 = vmul.f32 0.020408163, %v475_v14 }
 0x16c   :  { %v611_v12 = vadd.f32 1e-05, %v568_v26  ;;  %v732_v52 = vmul.f32 %v1410_v42, %v689_v60  ;;  %v1412_v44 = vpop.eup %1411 }
 0x16d   :  { %v478_v8 = vpop.xlane.xlu0 %477  ;;  %v481_v26 = vpop.xlane.xlu1 %480  ;;  %v729_v48 = vmul.f32 %v1412_v44, %v686_v24 }
 0x16e   :  { %1425 = vrsqrt.f32 %v611_v12  ;;  %v570_v32 = vmul.f32 0.020408163, %v478_v8  ;;  %858 = vperm.xlu1 %1354, %v725_v10   ;;  %893 = vperm.xlu0 %1353, %v732_v52   ;;  %v688_v52 = vld [vmem:[%s2583_s1 + $0xe0] sm:$0xff]  ;;  %v571_v44 = vmul.f32 0.020408163, %v481_v26 }
 0x16f   :  { %v1414_v40 = vpop.eup %1413  ;;  %1427 = vrsqrt.f32 %v608_v20  ;;  %v692_v26 = vld [vmem:[%s2583_s1 + $0x100] sm:$0xff] }
 0x170   :  { %v613_v43 = vadd.f32 1e-05, %v570_v32  ;;  %v734_v3 = vmul.f32 %v1414_v40, %v691_v56  ;;  %v1416_v42 = vpop.eup %1415  ;;  %v695_v56 = vld [vmem:[%s2583_s1 + $0x118] sm:$0xff]  ;;  %v612_v32 = vadd.f32 1e-05, %v569_v16  ;;  %v690_v40 = vld [vmem:[%s2583_s1 + $0xf0] sm:$0xff] }
 0x171   :  { %v484_v60 = vpop.xlane.xlu0 %483  ;;  %v487_v24 = vpop.xlane.xlu1 %486  ;;  %v699_v16 = vld [vmem:[%s2583_s1 + $0x138] sm:$0xff] }
 0x172   :  { %1429 = vrsqrt.f32 %v613_v43  ;;  %v572_v10 = vmul.f32 0.020408163, %v484_v60  ;;  %868 = vperm.xlu1 %1354, %v727_v18   ;;  %903 = vperm.xlu0 %1353, %v734_v3   ;;  %v731_v18 = vmul.f32 %v1416_v42, %v688_v52  ;;  %v697_v3 = vld [vmem:[%s2583_s1 + $0x128] sm:$0xff] }
 0x173   :  { %v1418_v12 = vpop.eup %1417  ;;  %1431 = vrsqrt.f32 %v610_v28  ;;  %v614_v28 = vadd.f32 1e-05, %v571_v44 }
 0x174   :  { %v615_v8 = vadd.f32 1e-05, %v572_v10  ;;  %v736_v20 = vmul.f32 %v1418_v12, %v693_v35  ;;  %v1420_v36 = vpop.eup %1419  ;;  %v573_v10 = vmul.f32 0.020408163, %v487_v24 }
 0x175   :  { %v733_v35 = vmul.f32 %v1420_v36, %v690_v40  ;;  %v696_v40 = vld [vmem:[%s2583_s1 + $0x120] sm:$0xff] }
 0x176   :  { %1433 = vrsqrt.f32 %v615_v8  ;;  %878 = vperm.xlu1 %1354, %v729_v48   ;;  %913 = vperm.xlu0 %1353, %v736_v20   ;;  %v616_v52 = vadd.f32 1e-05, %v573_v10 }
 0x177   :  { %v1422_v14 = vpop.eup %1421  ;;  %1435 = vrsqrt.f32 %v612_v32  ;;  %v701_v32 = vld [vmem:[%s2583_s1 + $0x148] sm:$0xff] }
 0x178   :  { %v738_v43 = vmul.f32 %v1422_v14, %v695_v56  ;;  %v1424_v60 = vpop.eup %1423  ;;  %1437 = vrsqrt.f32 %v614_v28  ;;  %v694_v56 = vld [vmem:[%s2583_s1 + $0x110] sm:$0xff] }
 0x179   :  { %v735_v8 = vmul.f32 %v1424_v60, %v692_v26  ;;  %1439 = vrsqrt.f32 %v616_v52  ;;  %v1016_v60 = vld [vmem:[%s2582_s2 + $0x60] sm:$0xff]  ;;  %v698_v28 = vld [vmem:[%s2583_s1 + $0x130] sm:$0xff]  ;;  %v1055_v52 = vpop.permute.xlu1 %1054 }
 0x17a   :  { %888 = vperm.xlu1 %1354, %v731_v18   ;;  %923 = vperm.xlu0 %1353, %v738_v43   ;;  %v1018_v26 = vld [vmem:[%s2582_s2 + $0x70] sm:$0xff] }
 0x17b   :  { %v1426_v42 = vpop.eup %1425 }
 0x17c   :  { %v740_v48 = vmul.f32 %v1426_v42, %v697_v3  ;;  %v1428_v12 = vpop.eup %1427 }
 0x17d   :  { %v737_v44 = vmul.f32 %v1428_v12, %v694_v56 }
 0x17e   :  { %898 = vperm.xlu1 %1354, %v733_v35   ;;  %933 = vperm.xlu0 %1353, %v740_v48   ;;  %v1050_v35 = vpop.permute.xlu0 %1049  ;;  %v700_v48 = vld [vmem:[%s2583_s1 + $0x140] sm:$0xff] }
 0x17f   :  { %v1430_v20 = vpop.eup %1429 }
 0x180   :  { %v742_v36 = vmul.f32 %v1430_v20, %v699_v16  ;;  %v1432_v18 = vpop.eup %1431  ;;  %v702_v20 = vld [vmem:[%s2583_s1 + $0x150] sm:$0xff] }
 0x181   :  { %v739_v43 = vmul.f32 %v1432_v18, %v696_v40  ;;  %v2198_v18 = vpop.permute.xlu1 %1064  ;;  %v1024_v40 = vld [vmem:[%s2582_s2 + $0xa0] sm:$0xff] }
 0x182   :  { %908 = vperm.xlu1 %1354, %v735_v8   ;;  %943 = vperm.xlu0 %1353, %v742_v36   ;;  %v1020_v8 = vld [vmem:[%s2582_s2 + $0x80] sm:$0xff]  ;;  %v1060_v56 = vpop.permute.xlu0 %1059 }
 0x183   :  { %v1434_v14 = vpop.eup %1433 }
 0x184   :  { %v744_v24 = vmul.f32 %v1434_v14, %v701_v32  ;;  %v1436_v3 = vpop.eup %1435  ;;  %v1022_v32 = vld [vmem:[%s2582_s2 + $0x90] sm:$0xff]  ;;  %v1017_v14 = vld [vmem:[%s2582_s2 + $0x68] sm:$0xff] }
 0x185   :  { %v741_v10 = vmul.f32 %v1436_v3, %v698_v28  ;;  %v1438_v42 = vpop.eup %1437  ;;  %v1026_v3 = vld [vmem:[%s2582_s2 + $0xb0] sm:$0xff]  ;;  %v1021_v28 = vld [vmem:[%s2582_s2 + $0x88] sm:$0xff] }
 0x186   :  { %918 = vperm.xlu1 %1354, %v737_v44   ;;  %953 = vperm.xlu0 %1353, %v744_v24   ;;  %v743_v16 = vmul.f32 %v1438_v42, %v700_v48  ;;  %v1440_v12 = vpop.eup %1439  ;;  %v2200_v44 = vpop.permute.xlu0 %1069  ;;  %v1023_v48 = vld [vmem:[%s2582_s2 + $0x98] sm:$0xff] }
 0x187   :  { %v745_v36 = vmul.f32 %v1440_v12, %v702_v20  ;;  %v2208_v24 = vpop.permute.xlu1 %1074  ;;  %v1025_v20 = vld [vmem:[%s2582_s2 + $0xa8] sm:$0xff] }
 0x18a   :  { %928 = vperm.xlu1 %1354, %v739_v43   ;;  %1109 = vperm.xlu0 %1353, %v1016_v60   ;;  %v1019_v43 = vld [vmem:[%s2582_s2 + $0x78] sm:$0xff]  ;;  %v2216_v60 = vpop.permute.xlu0 %1079 }
 0x18b   :  { %v2224_v42 = vpop.permute.xlu1 %1084 }
 0x18e   :  { %938 = vperm.xlu1 %1354, %v741_v10   ;;  %1119 = vperm.xlu0 %1353, %v1018_v26   ;;  %v1028_v10 = vld [vmem:[%s2582_s2 + $0xc0] sm:$0xff]  ;;  %v2226_v26 = vpop.permute.xlu0 %1089 }
 0x18f   :  { %v1095_v12 = vpop.permute.xlu1 %1094 }
 0x192   :  { %948 = vperm.xlu1 %1354, %v743_v16   ;;  %1129 = vperm.xlu0 %1353, %v1020_v8   ;;  %v1030_v16 = vld [vmem:[%s2582_s2 + $0xd0] sm:$0xff]  ;;  %v2234_v8 = vpop.permute.xlu0 %1099 }
 0x196   :  { %958 = vperm.xlu1 %1354, %v745_v36   ;;  %1139 = vperm.xlu0 %1353, %v1022_v32   ;;  %v1032_v36 = vld [vmem:[%s2582_s2 + $0xe0] sm:$0xff]  ;;  %v1027_v32 = vld [vmem:[%s2582_s2 + $0xb8] sm:$0xff] }
 0x19a   :  { %1114 = vperm.xlu1 %1354, %v1017_v14   ;;  %1149 = vperm.xlu0 %1353, %v1024_v40   ;;  %v1034_v14 = vld [vmem:[%s2582_s2 + $0xf0] sm:$0xff]  ;;  %v1105_v40 = vpop.permute.xlu1 %1104 }
 0x19e   :  { %1124 = vperm.xlu1 %1354, %v1019_v43   ;;  %1159 = vperm.xlu0 %1353, %v1026_v3  }
 0x1a2   :  { %1134 = vperm.xlu1 %1354, %v1021_v28   ;;  %1169 = vperm.xlu0 %1353, %v1028_v10   ;;  %v1029_v28 = vld [vmem:[%s2582_s2 + $0xc8] sm:$0xff]  ;;  %v1036_v10 = vld [vmem:[%s2582_s2 + $0x100] sm:$0xff] }
 0x1a6   :  { %1144 = vperm.xlu1 %1354, %v1023_v48   ;;  %1179 = vperm.xlu0 %1353, %v1030_v16  }
 0x1aa   :  { %1154 = vperm.xlu1 %1354, %v1025_v20   ;;  %1189 = vperm.xlu0 %1353, %v1032_v36   ;;  %v1038_v36 = vld [vmem:[%s2582_s2 + $0x110] sm:$0xff] }
 0x1ad   :  { %v749_v43 = vpop.permute.xlu0 %748 }
 0x1ae   :  { %v961_v3 = vmul.f32 %v749_v43, %v1764_v55  ;;  %1164 = vperm.xlu1 %1354, %v1027_v32   ;;  %1199 = vperm.xlu0 %1353, %v1034_v14   ;;  %v1031_v55 = vld [vmem:[%s2582_s2 + $0xd8] sm:$0xff]  ;;  %v1040_v43 = vld [vmem:[%s2582_s2 + $0x120] sm:$0xff] }
 0x1b0   :  { %v1262_v48 = vadd.f32 %v1050_v35, %v961_v3 }
 0x1b1   :  { %v754_v16 = vpop.permute.xlu1 %753 }
 0x1b2   :  { %1305 = vst.msk [vmem:[%s2584_s3] sm:$0xff] %vm57_vm0, %v1262_v48  ;;  %v962_v20 = vmul.f32 %v754_v16, %v1774_v15  ;;  %1174 = vperm.xlu1 %1354, %v1029_v28   ;;  %1209 = vperm.xlu0 %1353, %v1036_v10   ;;  %v1033_v15 = vld [vmem:[%s2582_s2 + $0xe8] sm:$0xff]  ;;  %v1042_v10 = vld [vmem:[%s2582_s2 + $0x130] sm:$0xff] }
 0x1b3   :  { %v1037_v16 = vld [vmem:[%s2582_s2 + $0x108] sm:$0xff] }
 0x1b4   :  { %v1263_v32 = vadd.f32 %v1055_v52, %v962_v20  ;;  %v1044_v20 = vld [vmem:[%s2582_s2 + $0x140] sm:$0xff] }
 0x1b5   :  { %v759_v35 = vpop.permute.xlu1 %758 }
 0x1b6   :  { %1306 = vst.msk [vmem:[%s2584_s3 + $0x8] sm:$0xff] %vm57_vm0, %v1263_v32  ;;  %v963_v14 = vmul.f32 %v759_v35, %v1767_v58  ;;  %1184 = vperm.xlu1 %1354, %v1031_v55   ;;  %1219 = vperm.xlu0 %1353, %v1038_v36   ;;  %v1035_v58 = vld [vmem:[%s2582_s2 + $0xf8] sm:$0xff] }
 0x1b7   :  { %v1039_v35 = vld [vmem:[%s2582_s2 + $0x118] sm:$0xff] }
 0x1b8   :  { %v1264_v3 = vadd.f32 %v1060_v56, %v963_v14 }
 0x1b9   :  { %v764_v52 = vpop.permute.xlu1 %763 }
 0x1ba   :  { %1307 = vst.msk [vmem:[%s2584_s3 + $0x10] sm:$0xff] %vm57_vm0, %v1264_v3  ;;  %v964_v28 = vmul.f32 %v764_v52, %v1777_v22  ;;  %1194 = vperm.xlu1 %1354, %v1033_v15   ;;  %1229 = vperm.xlu0 %1353, %v1040_v43  }
 0x1bc   :  { %v1265_v56 = vadd.f32 %v2198_v18, %v964_v28 }
 0x1bd   :  { %v769_v48 = vpop.permute.xlu1 %768 }
 0x1be   :  { %1308 = vst.msk [vmem:[%s2584_s3 + $0x18] sm:$0xff] %vm57_vm0, %v1265_v56  ;;  %v965_v22 = vmul.f32 %v769_v48, %v1790_v46  ;;  %1204 = vperm.xlu1 %1354, %v1035_v58   ;;  %1239 = vperm.xlu0 %1353, %v1042_v10  }
 0x1c0   :  { %v1266_v18 = vadd.f32 %v2200_v44, %v965_v22  ;;  %v1046_v44 = vld [vmem:[%s2582_s2 + $0x150] sm:$0xff] }
 0x1c1   :  { %v774_v55 = vpop.permute.xlu1 %773  ;;  %v794_v36 = vpop.permute.xlu0 %793 }
 0x1c2   :  { %1309 = vst.msk [vmem:[%s2584_s3 + $0x20] sm:$0xff] %vm57_vm0, %v1266_v18  ;;  %v966_v46 = vmul.f32 %v774_v55, %v1786_v2  ;;  %v970_v32 = vmul.f32 %v794_v36, %v1810_v31  ;;  %1214 = vperm.xlu1 %1354, %v1037_v16   ;;  %1249 = vperm.xlu0 %1353, %v1044_v20  }
 0x1c4   :  { %v1267_v14 = vadd.f32 %v2208_v24, %v966_v46  ;;  %v1271_v15 = vadd.f32 %v1095_v12, %v970_v32  ;;  %v1041_v24 = vld [vmem:[%s2582_s2 + $0x128] sm:$0xff] }
 0x1c5   :  { %v779_v43 = vpop.permute.xlu1 %778  ;;  %v804_v3 = vpop.permute.xlu0 %803 }
 0x1c6   :  { %1310 = vst.msk [vmem:[%s2584_s3 + $0x28] sm:$0xff] %vm57_vm0, %v1267_v14  ;;  %1314 = vst.msk [vmem:[%s2584_s3 + $0x48] sm:$0xff] %vm57_vm0, %v1271_v15  ;;  %v967_v2 = vmul.f32 %v779_v43, %v1802_v6  ;;  %v972_v31 = vmul.f32 %v804_v3, %v1822_v54  ;;  %1224 = vperm.xlu1 %1354, %v1039_v35   ;;  %1259 = vperm.xlu0 %1353, %v1046_v44   ;;  %v1043_v54 = vld [vmem:[%s2582_s2 + $0x138] sm:$0xff] }
 0x1c8   :  { %v1268_v12 = vadd.f32 %v2216_v60, %v967_v2  ;;  %v1273_v52 = vadd.f32 %v1105_v40, %v972_v31 }
 0x1c9   :  { %v784_v28 = vpop.permute.xlu1 %783  ;;  %v2328_v58 = vpop.permute.xlu0 %813 }
 0x1ca   :  { %1311 = vst.msk [vmem:[%s2584_s3 + $0x30] sm:$0xff] %vm57_vm0, %v1268_v12  ;;  %1316 = vst.msk [vmem:[%s2584_s3 + $0x58] sm:$0xff] %vm57_vm0, %v1273_v52  ;;  %v968_v6 = vmul.f32 %v784_v28, %v1798_v63  ;;  %1234 = vperm.xlu1 %1354, %v1041_v24   ;;  %v1045_v63 = vld [vmem:[%s2582_s2 + $0x148] sm:$0xff] }
 0x1cc   :  { %v1269_v60 = vadd.f32 %v2224_v42, %v968_v6 }
 0x1cd   :  { %v789_v40 = vpop.permute.xlu1 %788  ;;  %v2343_v10 = vpop.permute.xlu0 %823 }
 0x1ce   :  { %1312 = vst.msk [vmem:[%s2584_s3 + $0x38] sm:$0xff] %vm57_vm0, %v1269_v60  ;;  %v969_v56 = vmul.f32 %v789_v40, %v1814_v38  ;;  %1244 = vperm.xlu1 %1354, %v1043_v54  }
 0x1d0   :  { %v1270_v48 = vadd.f32 %v2226_v26, %v969_v56 }
 0x1d1   :  { %v799_v22 = vpop.permute.xlu1 %798  ;;  %v2354_v16 = vpop.permute.xlu0 %833 }
 0x1d2   :  { %1313 = vst.msk [vmem:[%s2584_s3 + $0x40] sm:$0xff] %vm57_vm0, %v1270_v48  ;;  %v971_v42 = vmul.f32 %v799_v22, %v1825_v17  ;;  %1254 = vperm.xlu1 %1354, %v1045_v63  }
 0x1d4   :  { %v1272_v38 = vadd.f32 %v2234_v8, %v971_v42 }
 0x1d5   :  { %v809_v20 = vpop.permute.xlu1 %808  ;;  %v2362_v18 = vpop.permute.xlu0 %843 }
 0x1d6   :  { %1315 = vst.msk [vmem:[%s2584_s3 + $0x50] sm:$0xff] %vm57_vm0, %v1272_v38  ;;  %v973_v40 = vmul.f32 %v809_v20, %v1837_v21 }
 0x1d9   :  { %v819_v26 = vpop.permute.xlu1 %818  ;;  %v2368_v55 = vpop.permute.xlu0 %853 }
 0x1da   :  { %v975_v22 = vmul.f32 %v819_v26, %v1849_v25 }
 0x1dd   :  { %v829_v36 = vpop.permute.xlu1 %828  ;;  %v2370_v46 = vpop.permute.xlu0 %863 }
 0x1de   :  { %v977_v50 = vmul.f32 %v829_v36, %v1861_v29  ;;  %v974_v36 = vmul.f32 %v2328_v58, %v1834_v1 }
 0x1e1   :  { %v839_v32 = vpop.permute.xlu1 %838  ;;  %v2372_v35 = vpop.permute.xlu0 %873 }
 0x1e2   :  { %v979_v26 = vmul.f32 %v839_v32, %v1873_v33 }
 0x1e5   :  { %v849_v17 = vpop.permute.xlu1 %848  ;;  %v2374_v44 = vpop.permute.xlu0 %883 }
 0x1e9   :  { %v859_v8 = vpop.permute.xlu1 %858  ;;  %v2376_v14 = vpop.permute.xlu0 %893 }
 0x1ed   :  { %v869_v15 = vpop.permute.xlu1 %868  ;;  %v2378_v43 = vpop.permute.xlu0 %903 }
 0x1f1   :  { %v879_v3 = vpop.permute.xlu1 %878  ;;  %v2380_v2 = vpop.permute.xlu0 %913 }
 0x1f5   :  { %v889_v31 = vpop.permute.xlu1 %888  ;;  %v2382_v24 = vpop.permute.xlu0 %923 }
 0x1f9   :  { %v2384_v12 = vpop.permute.xlu1 %898  ;;  %v2386_v52 = vpop.permute.xlu0 %933 }
 0x1fd   :  { %v2388_v28 = vpop.permute.xlu1 %908  ;;  %v2390_v6 = vpop.permute.xlu0 %943 }
 0x1fe   :  { %2589 = vst [vmem:[#allocation4_spill] sm:$0xff] %v2390_v6 }
 0x201   :  { %v2392_v54 = vpop.permute.xlu1 %918  ;;  %v2394_v60 = vpop.permute.xlu0 %953 }
 0x205   :  { %v2397_v56 = vpop.permute.xlu1 %928  ;;  %v1110_v63 = vpop.permute.xlu0 %1109 }
 0x206   :  { %v1274_v48 = vadd.f32 %v1110_v63, %v973_v40 }
 0x208   :  { %1317 = vst.msk [vmem:[%s2584_s3 + $0x60] sm:$0xff] %vm57_vm0, %v1274_v48 }
 0x209   :  { %v2404_v42 = vpop.permute.xlu1 %938  ;;  %v1120_v38 = vpop.permute.xlu0 %1119 }
 0x20a   :  { %v1276_v6 = vadd.f32 %v1120_v38, %v975_v22  ;;  %v976_v22 = vmul.f32 %v2343_v10, %v1846_v47  ;;  %v983_v38 = vmul.f32 %v859_v8, %v1897_v41  ;;  %v985_v47 = vmul.f32 %v869_v15, %v1909_v45 }
 0x20c   :  { %1319 = vst.msk [vmem:[%s2584_s3 + $0x70] sm:$0xff] %vm57_vm0, %v1276_v6  ;;  %v981_v6 = vmul.f32 %v849_v17, %v1885_v37 }
 0x20d   :  { %v2411_v21 = vpop.permute.xlu1 %948  ;;  %v1130_v20 = vpop.permute.xlu0 %1129 }
 0x20e   :  { %v1278_v25 = vadd.f32 %v1130_v20, %v977_v50  ;;  %v978_v20 = vmul.f32 %v2354_v16, %v1858_v7  ;;  %v987_v7 = vmul.f32 %v879_v3, %v1921_v49 }
 0x210   :  { %1321 = vst.msk [vmem:[%s2584_s3 + $0x80] sm:$0xff] %vm57_vm0, %v1278_v25 }
 0x211   :  { %v2418_v40 = vpop.permute.xlu1 %958  ;;  %v1140_v63 = vpop.permute.xlu0 %1139 }
 0x212   :  { %v1280_v29 = vadd.f32 %v1140_v63, %v979_v26  ;;  %v980_v26 = vmul.f32 %v2362_v18, %v1870_v39  ;;  %v989_v39 = vmul.f32 %v889_v31, %v1933_v53 }
 0x214   :  { %1323 = vst.msk [vmem:[%s2584_s3 + $0x90] sm:$0xff] %vm57_vm0, %v1280_v29  ;;  %v982_v29 = vmul.f32 %v2368_v55, %v1882_v62  ;;  %v991_v62 = vmul.f32 %v2384_v12, %v1945_v57  ;;  %v993_v57 = vmul.f32 %v2388_v28, %v1957_v61  ;;  %v995_v61 = vmul.f32 %v2392_v54, %v1969_v4 }
 0x215   :  { %v1115_v33 = vpop.permute.xlu1 %1114  ;;  %v1150_v50 = vpop.permute.xlu0 %1149  ;;  %v997_v4 = vmul.f32 %v2397_v56, %v1981_v11  ;;  %v999_v11 = vmul.f32 %v2404_v42, %v1993_v19  ;;  %v1001_v19 = vmul.f32 %v2411_v21, %v2005_v27  ;;  %v1003_v27 = vmul.f32 %v2418_v40, %v2014_v34  ;;  %v2590_v40 = vld [vmem:[#allocation2_spill] sm:$0xff] }
 0x216   :  { %v1275_v32 = vadd.f32 %v1115_v33, %v974_v36  ;;  %v1282_v48 = vadd.f32 %v1150_v50, %v981_v6  ;;  %v984_v6 = vmul.f32 %v2370_v46, %v1894_v30  ;;  %v986_v30 = vmul.f32 %v2372_v35, %v1906_v51 }
 0x217   :  { %v988_v51 = vmul.f32 %v2374_v44, %v1918_v0  ;;  %v990_v0 = vmul.f32 %v2376_v14, %v1930_v5  ;;  %v992_v5 = vmul.f32 %v2378_v43, %v1942_v9  ;;  %v994_v9 = vmul.f32 %v2380_v2, %v1954_v13 }
 0x218   :  { %1318 = vst.msk [vmem:[%s2584_s3 + $0x68] sm:$0xff] %vm57_vm0, %v1275_v32  ;;  %1325 = vst.msk [vmem:[%s2584_s3 + $0xa0] sm:$0xff] %vm57_vm0, %v1282_v48  ;;  %v996_v13 = vmul.f32 %v2382_v24, %v1966_v59  ;;  %v998_v59 = vmul.f32 %v2386_v52, %v1978_v23 }
 0x219   :  { %v1125_v1 = vpop.permute.xlu1 %1124  ;;  %v1160_v37 = vpop.permute.xlu0 %1159 }
 0x21a   :  { %v1277_v58 = vadd.f32 %v1125_v1, %v976_v22  ;;  %v1284_v17 = vadd.f32 %v1160_v37, %v983_v38 }
 0x21c   :  { %1320 = vst.msk [vmem:[%s2584_s3 + $0x78] sm:$0xff] %vm57_vm0, %v1277_v58  ;;  %1327 = vst.msk [vmem:[%s2584_s3 + $0xb0] sm:$0xff] %vm57_vm0, %v1284_v17 }
 0x21d   :  { %v1135_v41 = vpop.permute.xlu1 %1134  ;;  %v1170_v10 = vpop.permute.xlu0 %1169 }
 0x21e   :  { %v1279_v8 = vadd.f32 %v1135_v41, %v978_v20  ;;  %v1286_v25 = vadd.f32 %v1170_v10, %v985_v47  ;;  %v2591_v10 = vld [vmem:[#allocation4_spill] sm:$0xff] }
 0x220   :  { %1322 = vst.msk [vmem:[%s2584_s3 + $0x88] sm:$0xff] %vm57_vm0, %v1279_v8  ;;  %1329 = vst.msk [vmem:[%s2584_s3 + $0xc0] sm:$0xff] %vm57_vm0, %v1286_v25  ;;  %v1000_v8 = vmul.f32 %v2591_v10, %v2590_v40  ;;  %v2592_v25 = vld [vmem:[#allocation3_spill] sm:$0xff] }
 0x221   :  { %v1145_v45 = vpop.permute.xlu1 %1144  ;;  %v1180_v16 = vpop.permute.xlu0 %1179 }
 0x222   :  { %v1281_v15 = vadd.f32 %v1145_v45, %v980_v26  ;;  %v1288_v63 = vadd.f32 %v1180_v16, %v987_v7  ;;  %v1002_v26 = vmul.f32 %v2394_v60, %v2592_v25 }
 0x224   :  { %1324 = vst.msk [vmem:[%s2584_s3 + $0x98] sm:$0xff] %vm57_vm0, %v1281_v15  ;;  %1331 = vst.msk [vmem:[%s2584_s3 + $0xd0] sm:$0xff] %vm57_vm0, %v1288_v63 }
 0x225   :  { %v1155_v49 = vpop.permute.xlu1 %1154  ;;  %v1190_v18 = vpop.permute.xlu0 %1189 }
 0x226   :  { %v1283_v3 = vadd.f32 %v1155_v49, %v982_v29  ;;  %v1290_v36 = vadd.f32 %v1190_v18, %v989_v39 }
 0x228   :  { %1326 = vst.msk [vmem:[%s2584_s3 + $0xa8] sm:$0xff] %vm57_vm0, %v1283_v3  ;;  %1333 = vst.msk [vmem:[%s2584_s3 + $0xe0] sm:$0xff] %vm57_vm0, %v1290_v36 }
 0x229   :  { %v1165_v53 = vpop.permute.xlu1 %1164  ;;  %v1200_v55 = vpop.permute.xlu0 %1199 }
 0x22a   :  { %v1285_v31 = vadd.f32 %v1165_v53, %v984_v6  ;;  %v1292_v33 = vadd.f32 %v1200_v55, %v991_v62 }
 0x22c   :  { %1328 = vst.msk [vmem:[%s2584_s3 + $0xb8] sm:$0xff] %vm57_vm0, %v1285_v31  ;;  %1335 = vst.msk [vmem:[%s2584_s3 + $0xf0] sm:$0xff] %vm57_vm0, %v1292_v33 }
 0x22d   :  { %v1175_v46 = vpop.permute.xlu1 %1174  ;;  %v1210_v12 = vpop.permute.xlu0 %1209 }
 0x22e   :  { %v1287_v50 = vadd.f32 %v1175_v46, %v986_v30  ;;  %v1294_v32 = vadd.f32 %v1210_v12, %v993_v57 }
 0x230   :  { %1330 = vst.msk [vmem:[%s2584_s3 + $0xc8] sm:$0xff] %vm57_vm0, %v1287_v50  ;;  %1337 = vst.msk [vmem:[%s2584_s3 + $0x100] sm:$0xff] %vm57_vm0, %v1294_v32 }
 0x231   :  { %v1185_v35 = vpop.permute.xlu1 %1184  ;;  %v1220_v28 = vpop.permute.xlu0 %1219 }
 0x232   :  { %v1289_v48 = vadd.f32 %v1185_v35, %v988_v51  ;;  %v1296_v22 = vadd.f32 %v1220_v28, %v995_v61 }
 0x234   :  { %1332 = vst.msk [vmem:[%s2584_s3 + $0xd8] sm:$0xff] %vm57_vm0, %v1289_v48  ;;  %1339 = vst.msk [vmem:[%s2584_s3 + $0x110] sm:$0xff] %vm57_vm0, %v1296_v22 }
 0x235   :  { %v1195_v44 = vpop.permute.xlu1 %1194  ;;  %v1230_v54 = vpop.permute.xlu0 %1229 }
 0x236   :  { %v1291_v38 = vadd.f32 %v1195_v44, %v990_v0  ;;  %v1298_v1 = vadd.f32 %v1230_v54, %v997_v4 }
 0x238   :  { %1334 = vst.msk [vmem:[%s2584_s3 + $0xe8] sm:$0xff] %vm57_vm0, %v1291_v38  ;;  %1341 = vst.msk [vmem:[%s2584_s3 + $0x120] sm:$0xff] %vm57_vm0, %v1298_v1 }
 0x239   :  { %v1205_v14 = vpop.permute.xlu1 %1204  ;;  %v1240_v56 = vpop.permute.xlu0 %1239 }
 0x23a   :  { %v1293_v37 = vadd.f32 %v1205_v14, %v992_v5  ;;  %v1300_v58 = vadd.f32 %v1240_v56, %v999_v11 }
 0x23c   :  { %1336 = vst.msk [vmem:[%s2584_s3 + $0xf8] sm:$0xff] %vm57_vm0, %v1293_v37  ;;  %1343 = vst.msk [vmem:[%s2584_s3 + $0x130] sm:$0xff] %vm57_vm0, %v1300_v58 }
 0x23d   :  { %v1215_v43 = vpop.permute.xlu1 %1214  ;;  %v1250_v42 = vpop.permute.xlu0 %1249 }
 0x23e   :  { %v1295_v17 = vadd.f32 %v1215_v43, %v994_v9  ;;  %v1302_v20 = vadd.f32 %v1250_v42, %v1001_v19 }
 0x240   :  { %1338 = vst.msk [vmem:[%s2584_s3 + $0x108] sm:$0xff] %vm57_vm0, %v1295_v17  ;;  %1345 = vst.msk [vmem:[%s2584_s3 + $0x140] sm:$0xff] %vm57_vm0, %v1302_v20 }
 0x241   :  { %v1225_v2 = vpop.permute.xlu1 %1224  ;;  %v1260_v21 = vpop.permute.xlu0 %1259 }
 0x242   :  { %v1297_v47 = vadd.f32 %v1225_v2, %v996_v13  ;;  %v1304_v41 = vadd.f32 %v1260_v21, %v1003_v27 }
 0x244   :  { %1340 = vst.msk [vmem:[%s2584_s3 + $0x118] sm:$0xff] %vm57_vm0, %v1297_v47  ;;  %1347 = vst.msk [vmem:[%s2584_s3 + $0x150] sm:$0xff] %vm57_vm0, %v1304_v41 }
 0x245   :  { %v1235_v34 = vpop.permute.xlu1 %1234 }
 0x246   :  { %v1299_v24 = vadd.f32 %v1235_v34, %v998_v59 }
 0x248   :  { %1342 = vst.msk [vmem:[%s2584_s3 + $0x128] sm:$0xff] %vm57_vm0, %v1299_v24 }
 0x249   :  { %v1245_v23 = vpop.permute.xlu1 %1244 }
 0x24a   :  { %v1301_v52 = vadd.f32 %v1245_v23, %v1000_v8 }
 0x24c   :  { %1344 = vst.msk [vmem:[%s2584_s3 + $0x138] sm:$0xff] %vm57_vm0, %v1301_v52 }
 0x24d   :  { %v1255_v7 = vpop.permute.xlu1 %1254 }
 0x24e   :  { %v1303_v45 = vadd.f32 %v1255_v7, %v1002_v26 }
 0x250   :  { %1346 = vst.msk [vmem:[%s2584_s3 + $0x148] sm:$0xff] %vm57_vm0, %v1303_v45 }

</bundles_post_ra>
